<compile_context>
chip_gen: v5e
topology: v5e:2x2
jax: 0.10.0
libtpu: 0.0.40
codegen_flags: <defaults>
</compile_context>

<pallas_src>
import functools
import math

import jax
import jax.numpy as jnp
from jax.experimental import pallas as pl
from jax.experimental.pallas import tpu as pltpu


def _cost_kernel(pred_ref, target_ref, w_ref, out_ref, acc_ref, *, inv_count):
    i = pl.program_id(1)          # reduction ("arbitrary") axis

    @pl.when(i == 0)
    def _():
        acc_ref[...] = jnp.zeros_like(acc_ref)

    # Steady state: pure VPU elementwise work, accumulated per lane in f32.
    diff = jnp.abs(pred_ref[...] - target_ref[...])
    acc_ref[...] += diff * w_ref[...]          # (tile_rows, W) * (1, W) -> f32

    @pl.when(i == pl.num_programs(1) - 1)
    def _():
        # One cross-lane reduction + mean scaling per core/chunk.
        val = jnp.sum(acc_ref[...]) * inv_count
        out_ref[...] = jnp.zeros_like(out_ref) + val   # lane-dense store


class Cost:
    """JAX/Pallas equivalent of the PyTorch Cost module (weighted-L1 mean)."""

    _NUM_CHUNKS = 2                      # leading "parallel" grid axis (v7x megacore)
    _TARGET_TILE_BYTES = 2 * 1024 * 1024  # per-input block target (f32)
    _MAX_TILE_ROWS = 4096

    def __init__(self, decay_factor: float, rollout_length: int):
        self.decay_factor = float(decay_factor)
        self.rollout_length = int(rollout_length)
        t = jnp.arange(self.rollout_length, dtype=jnp.float32)
        self.decay_weight = self.decay_factor ** t          # shape (T,)

    def __call__(self, pred, target, *, use_xla_fast_path: bool = False):
        assert pred.shape == target.shape
        assert pred.shape[-1] == self.rollout_length
        T = self.rollout_length
        total = int(math.prod(pred.shape))        # torch.mean divisor

        if use_xla_fast_path and total < (1 << 20):
            # Tiny inputs: pallas_call launch overhead dominates; let XLA fuse it.
            return jnp.mean(jnp.abs(pred - target) * self.decay_weight)

        # ---- lane-dense layout: W = k*T is a multiple of 128 lanes ----------
        k = 128 // math.gcd(T, 128)
        W = k * T
        w_row = jnp.tile(self.decay_weight, k).reshape(1, W)

        # ---- tile sizing -----------------------------------------------------
        bytes_per_row = W * 4
        tile_cap = max(8, min(self._MAX_TILE_ROWS,
                              (self._TARGET_TILE_BYTES // max(1, bytes_per_row)) // 8 * 8))

        rows_needed = (total + W - 1) // W
        P = self._NUM_CHUNKS
        rows_per_chunk = (rows_needed + P - 1) // P
        tile_rows = min(tile_cap, ((rows_per_chunk + 7) // 8) * 8)
        bpc = max(1, (rows_needed + P * tile_rows - 1) // (P * tile_rows))
        rows_padded = P * bpc * tile_rows
        padded_total = rows_padded * W

        # Zero-pad (|0 - 0| * w == 0, so padding contributes nothing) only when
        # required, then reshape to the lane-dense (rows, W) slab (reshape of a
        # contiguous flat array is free).
        def _prep(x):
            flat = jnp.ravel(x)
            if padded_total != total:
                flat = jnp.pad(flat, (0, padded_total - total))
            return flat.reshape(rows_padded, W)

        pred2 = _prep(pred)
        target2 = _prep(target)

        # Only raise the scoped-VMEM limit if a (pathological) tile needs it.
        tile_bytes = tile_rows * W * 4
        vmem_estimate = 5 * tile_bytes + W * 4 + (1 << 16)
        cp_kwargs = dict(dimension_semantics=("parallel", "arbitrary"))
        if vmem_estimate > (12 << 20):
            cp_kwargs["vmem_limit_bytes"] = min(2 * vmem_estimate, 100 << 20)

        kernel = functools.partial(_cost_kernel, inv_count=1.0 / total)

        partials = pl.pallas_call(
            kernel,
            out_shape=jax.ShapeDtypeStruct((P, 8, 128), jnp.float32),
            grid_spec=pltpu.PrefetchScalarGridSpec(
                num_scalar_prefetch=0,
                grid=(P, bpc),
                in_specs=[
                    pl.BlockSpec((tile_rows, W), lambda c, i: (c * bpc + i, 0)),
                    pl.BlockSpec((tile_rows, W), lambda c, i: (c * bpc + i, 0)),
                    pl.BlockSpec((1, W), lambda c, i: (0, 0)),
                ],
                out_specs=pl.BlockSpec((1, 8, 128), lambda c, i: (c, 0, 0)),
                scratch_shapes=[pltpu.VMEM((tile_rows, W), jnp.float32)],
            ),
            compiler_params=pltpu.CompilerParams(**cp_kwargs),
        )(pred2, target2, w_row)

        # Each core's (8,128) block is filled with its partial mean; sum them.
        return jnp.sum(partials[:, 0, 0])


if __name__ == "__main__":
    decay_factor = 0.97
    rollout_length = 8
    batch = 16

    key = jax.random.PRNGKey(0)
    k1, k2 = jax.random.split(key)
    pred = jax.random.normal(k1, (batch, rollout_length), dtype=jnp.float32)
    target = jax.random.normal(k2, (batch, rollout_length), dtype=jnp.float32)

    cost = Cost(decay_factor, rollout_length)
    loss = jax.block_until_ready(cost(pred, target))

    # Pure-JAX reference (same semantics as the PyTorch module).
    ref = jnp.mean(jnp.abs(pred - target) * cost.decay_weight)
    assert jnp.allclose(loss, ref, rtol=1e-5, atol=1e-6), (loss, ref)

    print("KERNEL_OK")
</pallas_src>

<mosaic_0001>
module attributes {stable_mosaic.version = 11 : i64} {
  func.func @_cost_kernel(%arg0: i32, %arg1: i32, %arg2: memref<8x128xf32, #tpu.memory_space<vmem>>, %arg3: memref<8x128xf32, #tpu.memory_space<vmem>>, %arg4: memref<1x128xf32, #tpu.memory_space<vmem>>, %arg5: memref<1x8x128xf32, #tpu.memory_space<vmem>>, %arg6: memref<8x128xf32, #tpu.memory_space<vmem>>) attributes {dimension_semantics = [#tpu.dimension_semantics<parallel>, #tpu.dimension_semantics<arbitrary>], iteration_bounds = array<i64: 2, 1>, scalar_prefetch = 0 : i64, scratch_operands = 1 : i64, tpu.core_type = #tpu.core_type<tc>, window_params = [{transform_indices = @transform_0, window_bounds = array<i64: 8, 128>}, {transform_indices = @transform_1, window_bounds = array<i64: 8, 128>}, {pipeline_mode = #tpu.pipeline_mode<synchronous>, transform_indices = @transform_2, window_bounds = array<i64: 1, 128>}, {transform_indices = @transform_3, window_bounds = array<i64: 1, 8, 128>}]} {
    %c0_i32 = arith.constant 0 : i32
    %0 = arith.cmpi eq, %arg1, %c0_i32 : i32
    %1 = arith.extui %0 : i1 to i32
    %c0_i32_0 = arith.constant 0 : i32
    %2 = arith.cmpi ne, %1, %c0_i32_0 : i32
    scf.if %2 {
      %cst = arith.constant 0.000000e+00 : f32
      %16 = vector.broadcast %cst : f32 to vector<8x128xf32>
      %c0_12 = arith.constant 0 : index
      %c0_13 = arith.constant 0 : index
      %17 = vector.load %arg6[%c0_12, %c0_13] : memref<8x128xf32, #tpu.memory_space<vmem>>, vector<8x128xf32>
      tpu.vector_store %arg6[%c0_12, %c0_13], %16 {strides = array<i32>} : memref<8x128xf32, #tpu.memory_space<vmem>>, vector<8x128xf32>,
    } else {
    }
    %c0 = arith.constant 0 : index
    %c0_1 = arith.constant 0 : index
    %3 = vector.load %arg2[%c0, %c0_1] : memref<8x128xf32, #tpu.memory_space<vmem>>, vector<8x128xf32>
    %c0_2 = arith.constant 0 : index
    %c0_3 = arith.constant 0 : index
    %4 = vector.load %arg3[%c0_2, %c0_3] : memref<8x128xf32, #tpu.memory_space<vmem>>, vector<8x128xf32>
    %5 = arith.subf %3, %4 : vector<8x128xf32>
    %6 = math.absf %5 : vector<8x128xf32>
    %c0_4 = arith.constant 0 : index
    %c0_5 = arith.constant 0 : index
    %7 = vector.load %arg6[%c0_4, %c0_5] : memref<8x128xf32, #tpu.memory_space<vmem>>, vector<8x128xf32>
    %c0_6 = arith.constant 0 : index
    %c0_7 = arith.constant 0 : index
    %8 = vector.load %arg4[%c0_6, %c0_7] : memref<1x128xf32, #tpu.memory_space<vmem>>, vector<1x128xf32>
    %9 = vector.broadcast %8 : vector<1x128xf32> to vector<8x128xf32>
    %10 = arith.mulf %6, %9 : vector<8x128xf32>
    %11 = arith.addf %7, %10 : vector<8x128xf32>
    %c0_8 = arith.constant 0 : index
    %c0_9 = arith.constant 0 : index
    %12 = vector.load %arg6[%c0_8, %c0_9] : memref<8x128xf32, #tpu.memory_space<vmem>>, vector<8x128xf32>
    tpu.vector_store %arg6[%c0_8, %c0_9], %11 {strides = array<i32>} : memref<8x128xf32, #tpu.memory_space<vmem>>, vector<8x128xf32>,
    %c0_i32_10 = arith.constant 0 : i32
    %13 = arith.cmpi eq, %arg1, %c0_i32_10 : i32
    %14 = arith.extui %13 : i1 to i32
    %c0_i32_11 = arith.constant 0 : i32
    %15 = arith.cmpi ne, %14, %c0_i32_11 : i32
    scf.if %15 {
      %c0_12 = arith.constant 0 : index
      %c0_13 = arith.constant 0 : index
      %16 = vector.load %arg6[%c0_12, %c0_13] : memref<8x128xf32, #tpu.memory_space<vmem>>, vector<8x128xf32>
      %17 = vector.shape_cast %16 : vector<8x128xf32> to vector<1x8x128xf32>
      %cst = arith.constant dense<0.000000e+00> : vector<1xf32>
      %18 = vector.multi_reduction <add>, %17, %cst [1, 2] : vector<1x8x128xf32> to vector<1xf32>
      %19 = vector.shape_cast %18 : vector<1xf32> to vector<1x1x1xf32>
      %20 = vector.extract %19[0, 0, 0] : f32 from vector<1x1x1xf32>
      %cst_14 = arith.constant 7.812500e-03 : f32
      %21 = arith.mulf %20, %cst_14 : f32
      %cst_15 = arith.constant 0.000000e+00 : f32
      %22 = vector.broadcast %cst_15 : f32 to vector<1x8x128xf32>
      %23 = vector.broadcast %21 : f32 to vector<1x8x128xf32>
      %24 = arith.addf %22, %23 : vector<1x8x128xf32>
      %c0_16 = arith.constant 0 : index
      %c0_17 = arith.constant 0 : index
      %c0_18 = arith.constant 0 : index
      %25 = vector.load %arg5[%c0_16, %c0_17, %c0_18] : memref<1x8x128xf32, #tpu.memory_space<vmem>>, vector<1x8x128xf32>
      tpu.vector_store %arg5[%c0_16, %c0_17, %c0_18], %24 {strides = array<i32>} : memref<1x8x128xf32, #tpu.memory_space<vmem>>, vector<1x8x128xf32>,
    } else {
    }
    return
  }
  func.func @transform_0(%arg0: i32, %arg1: i32) -> (i32, i32) {
    %c1_i32 = arith.constant 1 : i32
    %0 = arith.muli %arg0, %c1_i32 : i32
    %1 = arith.addi %0, %arg1 : i32
    %c0_i32 = arith.constant 0 : i32
    %c0_i32_0 = arith.constant 0 : i32
    return %1, %c0_i32 : i32, i32
  }
  func.func @transform_1(%arg0: i32, %arg1: i32) -> (i32, i32) {
    %c1_i32 = arith.constant 1 : i32
    %0 = arith.muli %arg0, %c1_i32 : i32
    %1 = arith.addi %0, %arg1 : i32
    %c0_i32 = arith.constant 0 : i32
    %c0_i32_0 = arith.constant 0 : i32
    return %1, %c0_i32 : i32, i32
  }
  func.func @transform_2(%arg0: i32, %arg1: i32) -> (i32, i32) {
    %c0_i32 = arith.constant 0 : i32
    %c0_i32_0 = arith.constant 0 : i32
    %c0_i32_1 = arith.constant 0 : i32
    return %c0_i32, %c0_i32_0 : i32, i32
  }
  func.func @transform_3(%arg0: i32, %arg1: i32) -> (i32, i32, i32) {
    %c0_i32 = arith.constant 0 : i32
    %c0_i32_0 = arith.constant 0 : i32
    %c0_i32_1 = arith.constant 0 : i32
    return %arg0, %c0_i32, %c0_i32_0 : i32, i32, i32
  }
}

</mosaic_0001>

<bundles_post_ra>
// kernel: tpu_custom_call.1
= control target key start
LH: loop header
LB: loop body
LE: loop exit
PB: predicated region body
PF: predicated region fallthrough
CT: control target
= control target key end

     0   :  { %8 = vsyncpa [#allocation4], 0  ;;  %s790_s0 = inlined_call_operand.hbm [shape: f32[16,128], index: 0, kind: input, shape index: {}]   ;;  %s791_s1 = inlined_call_operand.hbm [shape: f32[16,128], index: 1, kind: input, shape index: {}]   ;;  %s792_s2 = inlined_call_operand.vmem [shape: f32[1,128], index: 2, kind: input, shape index: {}]   ;;  %s793_s3 = inlined_call_operand.hbm [shape: f32[2,8,128], index: 3, kind: output, shape index: {}]  }
   0x1   :  { %10 = vsyncpa [#allocation4 + $0x1], 0 }
   0x2   :  { %11 = vsyncpa [#allocation7], 0 }
   0x3   :  { %13 = vsyncpa [#allocation7 + $0x1], 0 }
   0x4   :  { %14 = vsyncpa [#allocation5], 0 }
   0x5   :  { %16 = vsyncpa [#allocation5 + $0x1], 0  ;;  %s654_s12 = smov 0   ;;  %s656_s13 = smov 0  }
   0x6   :  { %s658_s14 = smov 0   ;;  %s660_s15 = smov 0  }
   0x7   :  { %s662_s16 = smov 0   ;;  %s664_s17 = smov 0  }
   0x8 LB: > { %s400_s18 = sadd.s32 4294967295, %s632_s17   ;;  %s401_s19 = sadd.s32 4294967294, %s632_s17   ;;  %s632_s17 = sphi %s664_s17, %s22_s17   ;;  %s628_s16 = sphi %s662_s16, %s802_s16   ;;  %s624_s15 = sphi %s660_s15, %s801_s15   ;;  %s620_s14 = sphi %s658_s14, %s800_s14   ;;  %s616_s13 = sphi %s656_s13, %s799_s13   ;;  %s612_s12 = sphi %s654_s12, %s798_s12  }
   0x9   : > { %s34_s20 = sadd.s32 1, %s628_s16  ;;  %s43_s21 = sadd.s32 1, %s620_s14 }
   0xa   : > { %p36_p0 = scmp.ge.s32.totalorder %s34_s20, 2  ;;  %p50_p1 = scmp.ne.s32.totalorder %s620_s14, %s616_s13 }
   0xb   : > { %p51_p2 = scmp.eq.s32.totalorder %s632_s17, 0  ;;  %p56_p3 = scmp.ne.s32.totalorder %s616_s13, %s612_s12 }
   0xc   : > { %s804_s20 = smov (%p36_p0, %s34_s20), 0  ;;  %p57_p5 = scmp.eq.s32.totalorder %s400_s18, 0 }
   0xd   : > { %p695_p4 = por %p51_p2, %p50_p1  ;;  %s40_s23 = ssub.s32 %s628_s16, %s804_s20 }
   0xe   : > { %p129_p6 = scmp.eq.s32.totalorder %s400_s18, 1  ;;  %p41_p7 = scmp.eq.s32.totalorder %s40_s23, 0 }
   0xf   : > { %p701_p8 = por %p57_p5, %p56_p3  ;;  %p135_p10 = scmp.eq.s32.totalorder %s401_s19, 1 }
  0x10   : > { %p705_p9 = por %p129_p6, %p50_p1  ;;  %p403_p12 = scmp.ge.s32.totalorder %s632_s17, 2 }
  0x11   : > { %s710_s26 = scalar_select %p41_p7, %s620_s14, %s43_s21  }
  0x12   : > { %p712_p11 = por %p135_p10, %p56_p3  ;;  %p435_p13 = scmp.lt.s32.totalorder %s632_s17, 2 }
  0x13   : > { %s158_s28 = sand.u32 1, %s620_s14   ;;  %s405_s30 = sshll.u32 %s628_s16, 3 }
  0x14   : > { %s404_s29 = sshll.u32 %s158_s28, 3  ;;  %s167_s6 = scalar_lea.hbm %s790_s0, %s405_s30 }
  0x15   : > { %s162_s7 = scalar_lea.vmem [#allocation3], %s404_s29  ;;  %s169_s9 = sshll.u32 %s167_s6, 4  ;;  %s170_s9 = int_to_ptr.hbm [resolvable:$true] %s169_s9 }
  0x16   : > { %s171_s8 = sshll.u32 %s162_s7, 4  ;;  %p425_p0 = pnand %p435_p13, %p695_p4  ;;  %s172_s8 = int_to_ptr.vmem [resolvable:$true] %s171_s8 }
  0x17   : > { %p408_p1 = scmp.ge.s32.totalorder %s632_s17, 1  ;;  %p196_p2 = scmp.lt.s32.totalorder %s632_s17, 3 }
  0x18   : > { %s159_s10 = scalar_lea.sflag [#allocation4], %s158_s28  ;;  %s187_s19 = scalar_lea.hbm %s791_s1, %s405_s30 }
  0x19   : > { %427 = dma.hbm_to_vmem [thread:$0]  (!%p425_p0), %s170_s9, 128, %s172_s8, %s159_s10  }
  0x1a   : > { %p197_p3 = pnand %p408_p1, %p196_p2  ;;  %s182_s21 = scalar_lea.vmem [#allocation6], %s404_s29 }
  0x1b   : > { %s191_s23 = sshll.u32 %s182_s21, 4  ;;  %s189_s4 = sshll.u32 %s187_s19, 4  ;;  %s192_s23 = int_to_ptr.vmem [resolvable:$true] %s191_s23  ;;  %s190_s4 = int_to_ptr.hbm [resolvable:$true] %s189_s4 }
  0x1c   : > { %s179_s5 = scalar_lea.sflag [#allocation7], %s158_s28  ;;  %200 = sbr.rel (%p197_p3) target bundleno = 227 (0xe3), region = 32 }
  0x1d   : > { %430 = dma.hbm_to_vmem [thread:$0]  (!%p425_p0), %s190_s4, 128, %s192_s23, %s179_s5  }
  0x1e   : > { %s731_s22 = sand.u32 (!%p197_p3), 1, %s616_s13  }
  0x1f   : > { %s734_s6 = sshll.u32 (!%p197_p3), %s731_s22, 3  ;;  %s203_s7 = scalar_lea.sflag (!%p197_p3), [#allocation4], %s731_s22 }
  0x20   : > { %s206_s8 = scalar_lea.vmem (!%p197_p3), [#allocation3], %s734_s6 }
  0x21   : > { %599 = dma.done.wait (%p701_p8), %s203_s7, 128  }
  0x22   : > { %601 = vsyncadd (%p701_p8), %s203_s7, 4294967168  ;;  %s213_s28 = scalar_lea.sflag [#allocation7], %s731_s22  ;;  %s216_s29 = scalar_lea.vmem [#allocation6], %s734_s6 }
  0x23   : > { %603 = dma.done.wait (%p701_p8), %s213_s28, 128  }
  0x24   : > { %605 = vsyncadd (%p701_p8), %s213_s28, 4294967168  ;;  %v252_v0 = vld [vmem:[%s206_s8] sm:$0xff]  ;;  %v253_v1 = vld [vmem:[%s216_s29] sm:$0xff]  ;;  %s413_s24 = sshll.u32 %s624_s15, 3  ;;  %s244_s19 = scalar_lea.vmem [#allocation8], %s734_s6 }
  0x25   : > { %v254_v2 = vsub.f32 %v252_v0, %v253_v1  ;;  %v485_v3 = vld [vmem:[%s792_s2] ss:$0 sm:$0xff]  ;;  %s292_s18 = scalar_lea.hbm %s793_s3, %s413_s24  ;;  %s294_s21 = sshll.u32 %s244_s19, 4  ;;  %s295_s21 = int_to_ptr.vmem [resolvable:$true] %s294_s21 }
  0x26   : > { %s296_s23 = sshll.u32 %s292_s18, 4  ;;  %s282_s7 = scalar_lea.sflag [#allocation5], %s731_s22  ;;  %s297_s23 = int_to_ptr.hbm [resolvable:$true] %s296_s23 }
  0x27   : > { %v255_v4 = vand.u32 2147483647, %v254_v2  ;;  %s560_s8 = sshra.s32 %s297_s23, 4  ;;  %s566_s6 = scalar_lea.hbm %s793_s3, 16  ;;  %s561_s8 = int_to_ptr.hbm [resolvable:$true] %s560_s8 }
  0x28   : > { %s562_s28 = scalar_lea.hbm %s561_s8, 8  ;;  %p567_p7 = scmp.lt.s32.totalorder %s561_s8, %s793_s3 }
  0x29   : > { %v261_v5 = vmul.f32 %v485_v3, %v255_v4  ;;  %p563_p4 = scmp.ne.s32.totalorder %s561_s8, %s562_s28  ;;  %p568_p8 = scmp.lt.s32.totalorder %s566_s6, %s562_s28 }
  0x2b   : > { %268 = vadd.xlane.f32.xlu0 %v261_v5  ;;  %p564_p5 = pnand %p563_p4, %p705_p9  ;;  %p569_p10 = por %p568_p8, %p567_p7 }
  0x2d   : > { %p565_p6 = pneg %p564_p5 }
  0x2f   : > { %p570_p13 = pnand %p569_p10, %p565_p6 }
  0x9e   : > { %v269_v6 = vpop.xlane.xlu0 %268 }
  0x9f   : > { %v270_v7 = vrot.slane %v269_v6, 4 }
  0xa1   : > { %v271_v8 = vadd.f32 %v270_v7, %v269_v6 }
  0xa3   : > { %v272_v9 = vrot.slane %v271_v8, 2 }
  0xa5   : > { %v273_v10 = vadd.f32 %v272_v9, %v271_v8 }
  0xa7   : > { %v274_v11 = vrot.slane %v273_v10, 1 }
  0xa9   : > { %v275_v12 = vadd.f32 %v274_v11, %v273_v10 }
  0xab   : > { %416 = vpush %v275_v12 }
  0xdc   : > { %s417_s4 = spop %416 }
  0xdd   : > { %s277_s5 = smul.f32 0.0078125, %s417_s4 }
  0xdf   : > { %v278_v13 = vstv %s277_s5 }
  0xe0   : > { %280 = vst [vmem:[%s244_s19] sm:$0xff] %v278_v13 }
  0xe1   : > { %573 = shalt.err (!%p570_p13)
}
  0xe2   : > { %422 = dma.vmem_to_hbm [thread:$0]  (%p705_p9), %s295_s21, 128, %s297_s23, %s282_s7  }
  0xe3 PF: > { %s308_s22 = sand.u32 1, %s612_s12   ;;  %p432_p0 = pnand %p403_p12, %p712_p11 }
  0xe4   : > { %s309_s24 = scalar_lea.sflag [#allocation5], %s308_s22 }
  0xe5   : > { %p433_p1 = pneg %p432_p0 }
  0xe7   : > { %607 = dma.done.wait (%p433_p1), %s309_s24, 128  }
  0xe8   : > { %609 = vsyncadd (%p433_p1), %s309_s24, 4294967168  ;;  %s22_s17 = sadd.s32 1, %s632_s17   ;;  %s798_s12 = smov %s616_s13 }
  0xe9   : > { %p19_p2 = scmp.ge.s32.totalorder %s22_s17, 4   ;;  %s799_s13 = smov %s620_s14 }
  0xea   : > { %s800_s14 = smov %s710_s26  ;;  %s801_s15 = smov %s628_s16 }
  0xeb   : > { %s802_s16 = smov %s804_s20  ;;  %21 = sbr.rel (!%p19_p2) target bundleno = 8 (0x8), region = 98 }
  0xf0   :  { %315 = vsyncpa [#allocation4], 1 }
  0xf1   :  { %317 = vsyncpa [#allocation4 + $0x1], 1 }
  0xf2   :  { %318 = vsyncpa [#allocation7], 1 }
  0xf3   :  { %320 = vsyncpa [#allocation7 + $0x1], 1 }
  0xf4   :  { %321 = vsyncpa [#allocation5], 1 }
  0xf5   :  { %323 = vsyncpa [#allocation5 + $0x1], 1 }

</bundles_post_ra>
